<compile_context>
chip_gen: v6e
topology: v6e:2x2x1
jax: 0.10.0
libtpu: 0.0.40
codegen_flags: <defaults>
</compile_context>

<pallas_src>
import functools

import jax
import jax.numpy as jnp
from jax import lax
from jax.experimental import pallas as pl
from jax.experimental.pallas import tpu as pltpu


def _marker_embedding_kernel(idx_ref, emb_t_ref, out_ref, *, vocab_size):
    """One grid step gathers N_TILE channel embeddings via a one-hot matmul.

    idx_ref   : VMEM (1, N_TILE) int32   -- flattened (b, c) channel indices, -1 == pad
    emb_t_ref : VMEM (D, V)      float32 -- transposed embedding table (resident)
    out_ref   : VMEM (D, N_TILE) float32 -- transposed output tile (lane-dense)
    """
    idx = idx_ref[...]                                     # (1, n)
    emb_t = emb_t_ref[...]                                 # (D, V)
    n = idx.shape[1]

    # one_hot[v, col] = 1.0 iff idx[0, col] == v ; pad columns (-1) stay all-zero,
    # which yields a zero embedding for padded positions (matches F.pad value=0).
    vocab_iota = lax.broadcasted_iota(jnp.int32, (vocab_size, n), 0)
    one_hot = (vocab_iota == idx).astype(emb_t.dtype)      # (V, n)

    # Single MXU matmul + one dense (sublane- and lane-aligned) store.
    out_ref[...] = jnp.dot(emb_t, one_hot, preferred_element_type=jnp.float32)


def _pallas_marker_embedding(indices, emb_table_t, *, n_tile=256):
    """indices      : (B, max_c) int32, -1 at padded positions.
       emb_table_t  : (D, V) float32, transposed embedding table.
       returns      : (B, max_c, D) float32 embeddings."""
    B, max_c = indices.shape
    D, V = emb_table_t.shape

    n = B * max_c
    n_pad = pl.cdiv(n, n_tile) * n_tile                    # n_tile is a multiple of 128
    idx_flat = indices.reshape(1, n)
    if n_pad != n:
        idx_flat = jnp.pad(idx_flat, ((0, 0), (0, n_pad - n)), constant_values=-1)

    kernel = functools.partial(_marker_embedding_kernel, vocab_size=V)

    out_t = pl.pallas_call(
        kernel,
        out_shape=jax.ShapeDtypeStruct((D, n_pad), jnp.float32),
        grid=(n_pad // n_tile,),
        in_specs=[
            # Flattened indices: lane-dense (1, n_tile) block per step.
            pl.BlockSpec((1, n_tile), lambda i: (0, i)),
            # Full (tiny) transposed table resident in VMEM every step.
            # TODO(synk): for production-sized vocabularies, single-buffer this
            # block (pipeline_mode=pl.Buffered(1)) or keep the table in pl.ANY
            # and tile the one-hot contraction over V with an accumulator so it
            # fits v7x's 64 MiB VMEM.
            pl.BlockSpec((D, V), lambda i: (0, 0)),
        ],
        out_specs=pl.BlockSpec((D, n_tile), lambda i: (0, i)),
        compiler_params=pltpu.CompilerParams(
            dimension_semantics=("parallel",),             # independent tiles -> 2 TCs on v7x
            vmem_limit_bytes=32 * 1024 * 1024,             # above v5e's 16 MiB scoped default
        ),
    )(idx_flat, emb_table_t)

    # Back to the PyTorch layout (B, max_c, D) -- cheap XLA transpose/reshape.
    return out_t[:, :n].T.reshape(B, max_c, D)


class MarkerEmbedding:
    """JAX/Pallas port of the PyTorch MarkerEmbedding module."""

    def __init__(self, embedding_dim, vocab, key):
        self.embedding_dim = embedding_dim
        self.vocab = list(vocab)
        self.channel_to_idx = {v: i for i, v in enumerate(self.vocab)}
        # nn.Embedding default init is N(0, 1).
        self.weight = jax.random.normal(
            key, (len(self.vocab), embedding_dim), dtype=jnp.float32
        )
        # Pre-transposed table so the kernel's matmul emits a lane-dense tile.
        self.weight_t = self.weight.T

    def __call__(self, channel_names):
        """channel_names: list of list of str."""
        max_c = max(len(c) for c in channel_names)

        idx_rows, len_rows = [], []
        for channels in channel_names:
            c_indices = [self.channel_to_idx[c] for c in channels]
            pad_len = max_c - len(c_indices)
            idx_rows.append(c_indices + [-1] * pad_len)    # -1 => zero embedding
            len_rows.append(len(c_indices))

        indices = jnp.asarray(idx_rows, dtype=jnp.int32)   # (B, max_c)
        lengths = jnp.asarray(len_rows, dtype=jnp.int32)   # (B,)

        embeddings = _pallas_marker_embedding(indices, self.weight_t)

        # Padding mask is free in plain XLA; no need to burn a kernel output on it.
        mask = jnp.arange(max_c, dtype=jnp.int32)[None, :] >= lengths[:, None]
        return embeddings, mask


def _reference(module, channel_names):
    """Pure-JAX reference replicating the PyTorch forward."""
    max_c = max(len(c) for c in channel_names)
    embs, masks = [], []
    for channels in channel_names:
        idx = jnp.asarray(
            [module.channel_to_idx[c] for c in channels], dtype=jnp.int32
        )
        e = module.weight[idx]
        pad = max_c - len(channels)
        if pad > 0:
            e = jnp.pad(e, ((0, pad), (0, 0)))
        embs.append(e)
        masks.append([False] * len(channels) + [True] * pad)
    return jnp.stack(embs, axis=0), jnp.asarray(masks, dtype=jnp.bool_)


if __name__ == "__main__":
    embedding_dim = 32
    vocab = [f"marker_{i}" for i in range(12)]

    key = jax.random.PRNGKey(0)
    module = MarkerEmbedding(embedding_dim, vocab, key)

    # Batch of 2 samples with differing channel counts (max_c = 8).
    channel_names = [
        ["marker_0", "marker_3", "marker_7", "marker_1", "marker_11",
         "marker_5", "marker_9", "marker_2"],
        ["marker_4", "marker_6", "marker_10", "marker_8", "marker_0"],
    ]

    emb, mask = module(channel_names)
    emb = jax.block_until_ready(emb)
    mask = jax.block_until_ready(mask)

    ref_emb, ref_mask = _reference(module, channel_names)

    assert emb.shape == (2, 8, embedding_dim), emb.shape
    assert mask.shape == (2, 8), mask.shape
    assert emb.dtype == jnp.float32
    assert mask.dtype == jnp.bool_
    assert jnp.allclose(emb, ref_emb, atol=1e-6), "embedding mismatch"
    assert bool(jnp.all(mask == ref_mask)), "mask mismatch"

    print("KERNEL_OK")
</pallas_src>

<mosaic_0001>
module attributes {stable_mosaic.version = 11 : i64} {
  func.func @_marker_embedding_kernel(%arg0: i32, %arg1: memref<1x256xi32, #tpu.memory_space<vmem>>, %arg2: memref<32x12xf32, #tpu.memory_space<vmem>>, %arg3: memref<32x256xf32, #tpu.memory_space<vmem>>) attributes {dimension_semantics = [#tpu.dimension_semantics<parallel>], iteration_bounds = array<i64: 1>, scalar_prefetch = 0 : i64, scratch_operands = 0 : i64, tpu.core_type = #tpu.core_type<tc>, window_params = [{transform_indices = @transform_0, window_bounds = array<i64: 1, 256>}, {pipeline_mode = #tpu.pipeline_mode<synchronous>, transform_indices = @transform_1, window_bounds = array<i64: 32, 12>}, {transform_indices = @transform_2, window_bounds = array<i64: 32, 256>}]} {
    %c0 = arith.constant 0 : index
    %c0_0 = arith.constant 0 : index
    %0 = vector.load %arg1[%c0, %c0_0] : memref<1x256xi32, #tpu.memory_space<vmem>>, vector<1x256xi32>
    %c0_1 = arith.constant 0 : index
    %c0_2 = arith.constant 0 : index
    %1 = vector.load %arg2[%c0_1, %c0_2] : memref<32x12xf32, #tpu.memory_space<vmem>>, vector<32x12xf32>
    %2 = tpu.iota {dimensions = array<i32: 0>} : vector<12x256xi32>
    %3 = vector.broadcast %0 : vector<1x256xi32> to vector<12x256xi32>
    %4 = arith.cmpi eq, %2, %3 : vector<12x256xi32>
    %5 = arith.extui %4 : vector<12x256xi1> to vector<12x256xi32>
    %6 = arith.sitofp %5 : vector<12x256xi32> to vector<12x256xf32>
    %cst = arith.constant dense<0.000000e+00> : vector<32x256xf32>
    %7 = tpu.matmul %1, %6, %cst {dimension_numbers = #tpu.dot_dimension_numbers<[1], [0], [0], [1], [0, 0, 1, 1], [], []>} : vector<32x12xf32>, vector<12x256xf32>, vector<32x256xf32> -> vector<32x256xf32>
    %c0_3 = arith.constant 0 : index
    %c0_4 = arith.constant 0 : index
    %8 = vector.load %arg3[%c0_3, %c0_4] : memref<32x256xf32, #tpu.memory_space<vmem>>, vector<32x256xf32>
    tpu.vector_store %arg3[%c0_3, %c0_4], %7 {strides = array<i32>} : memref<32x256xf32, #tpu.memory_space<vmem>>, vector<32x256xf32>,
    return
  }
  func.func @transform_0(%arg0: i32) -> (i32, i32) {
    %c0_i32 = arith.constant 0 : i32
    %c0_i32_0 = arith.constant 0 : i32
    return %c0_i32, %arg0 : i32, i32
  }
  func.func @transform_1(%arg0: i32) -> (i32, i32) {
    %c0_i32 = arith.constant 0 : i32
    %c0_i32_0 = arith.constant 0 : i32
    %c0_i32_1 = arith.constant 0 : i32
    return %c0_i32, %c0_i32_0 : i32, i32
  }
  func.func @transform_2(%arg0: i32) -> (i32, i32) {
    %c0_i32 = arith.constant 0 : i32
    %c0_i32_0 = arith.constant 0 : i32
    return %c0_i32, %arg0 : i32, i32
  }
}

</mosaic_0001>

<bundles_post_ra>
// kernel: tpu_custom_call.1
= control target key start
LH: loop header
LB: loop body
LE: loop exit
PB: predicated region body
PF: predicated region fallthrough
CT: control target
= control target key end

     0   :  { %v17_v0 = vlaneseq  ;;  %v216_v1 = vmov 0.0   ;;  %s254_s0 = inlined_call_operand.vmem [shape: s32[1,256], index: 0, kind: input, shape index: {}]   ;;  %s255_s1 = inlined_call_operand.vmem [shape: f32[32,12], index: 1, kind: input, shape index: {}]   ;;  %s256_s2 = inlined_call_operand.hbm [shape: f32[32,256], index: 2, kind: output, shape index: {}]  }
   0x1   :  { %124 = vmatprep.mubr.f32.mxu0 %v216_v1  ;;  %136 = vmatprep.mubr.f32.mxu1 %v216_v1 }
   0x2   :  { %v18_v2 = vshrl.u32 %v17_v0, 7 }
   0x3   :  { %7 = vsyncpa [#allocation3], 0  ;;  %v12_v3 = vld [vmem:[%s254_s0] sm:$0x3]  ;;  %vm53_vm0 = vcmask 1043456   ;;  %vm40_vm5 = vcmask 97280  }
   0x4   :  { %v19_v4 = vadd.s32 8, %v18_v2  ;;  %v26_v5 = vsub.s32 1, %v18_v2  ;;  %v22_v6 = vsub.s32 0, %v18_v2  ;;  %v13_v11 = vld [vmem:[%s255_s1] sm:$0xff]  ;;  %v15_v12 = vld [vmem:[%s255_s1 + $0x10] sm:$0xff]  ;;  %v217_v13 = vmov 1.0  }
   0x5   :  { %v14_v14 = vld [vmem:[%s255_s1 + $0x8] sm:$0xff]  ;;  %v16_v15 = vld [vmem:[%s255_s1 + $0x18] sm:$0xff]  ;;  %s218_s18 = smov [#allocation2]  }
   0x6   :  { %v27_v7 = vrot.slane %v12_v3, %v26_v5  ;;  %v23_v8 = vrot.slane %v12_v3, %v22_v6  ;;  %s162_s19 = sshll.u32 %s218_s18, 4  ;;  %s163_s19 = int_to_ptr.vmem [resolvable:$true] %s162_s19 }
   0x7   :  { %s194_s1 = scalar_lea.vmem %s163_s19, 1024  ;;  %p199_p1 = scmp.lt.s32.totalorder %s163_s19, %s163_s19 }
   0x8   :  { %vm31_vm1 = vcmp.eq.s32.totalorder %v19_v4, %v27_v7  ;;  %vm30_vm2 = vcmp.eq.s32.totalorder %v19_v4, %v23_v8  ;;  %vm29_vm3 = vcmp.eq.s32.totalorder %v18_v2, %v27_v7  ;;  %vm28_vm4 = vcmp.eq.s32.totalorder %v18_v2, %v23_v8  ;;  %p195_p0 = scmp.ne.s32.totalorder %s163_s19, %s194_s1  ;;  %p200_p2 = scmp.lt.s32.totalorder %s194_s1, %s194_s1 }
   0x9   :  { %v176_v9 = vsel %vm31_vm1, 1.0, %v216_v1  ;;  %v175_v10 = vsel %vm30_vm2, 1.0, %v216_v1 }
   0xa   :  { %177 = vmatprep.subr.msk.mxu0 %vm53_vm0, %v176_v9  ;;  %185 = vmatprep.subr.msk.mxu1 %vm53_vm0, %v176_v9  ;;  %p201_p3 = por %p200_p2, %p199_p1 }
   0xb   :  { %178 = vmatpush1.msk.msra.mxu0 %vm53_vm0, %v175_v10  ;;  %187 = vmatpush1.msk.msra.mxu1 %vm53_vm0, %v175_v10 }
   0xc   :  { %179 = vmatprep.subr.msk.mxu0 %vm29_vm3, %v217_v13  ;;  %186 = vmatprep.subr.msk.mxu1 %vm29_vm3, %v217_v13  ;;  %p202_p4 = pnand %p201_p3, %p195_p0 }
   0xd   :  { %180 = vmatpush1.msk.msra.mxu0 %vm28_vm4, %v217_v13  ;;  %188 = vmatpush1.msk.msra.mxu1 %vm28_vm4, %v217_v13 }
   0xe   :  { %181 = vmatmul.mubr.msk.f32.vlgmr.msra.gmra.mxu0 %vm40_vm5, %v13_v11  ;;  %183 = vmatmul.mubr.msk.f32.vlgmr.msra.gmra.mxu1 %vm40_vm5, %v15_v12 }
   0xf   :  { %130 = vmatprep.mubr.f32.mxu0 %v216_v1  ;;  %142 = vmatprep.mubr.f32.mxu1 %v216_v1 }
  0x12   :  { %182 = vmatmul.mubr.msk.f32.gmra.mxu0 %vm40_vm5, %v14_v14  ;;  %184 = vmatmul.mubr.msk.f32.gmra.mxu1 %vm40_vm5, %v16_v15 }
  0xce   :  { %v126_v16 = vpop.f32.mrf.mxu0  ;;  %v138_v17 = vpop.f32.mrf.mxu1 }
  0xcf   :  { %149 = vst [vmem:[#allocation2] sm:$0xff] %v126_v16  ;;  %153 = vst [vmem:[#allocation2 + $0x20] sm:$0xff] %v138_v17 }
  0xd0   :  { %v128_v18 = vpop.f32.mrf.mxu0  ;;  %v140_v19 = vpop.f32.mrf.mxu1 }
  0xd1   :  { %150 = vst [vmem:[#allocation2 + $0x8] sm:$0xff] %v128_v18  ;;  %154 = vst [vmem:[#allocation2 + $0x28] sm:$0xff] %v140_v19 }
  0xd2   :  { %v132_v20 = vpop.f32.mrf.mxu0  ;;  %v144_v21 = vpop.f32.mrf.mxu1 }
  0xd3   :  { %151 = vst [vmem:[#allocation2 + $0x10] sm:$0xff] %v132_v20  ;;  %155 = vst [vmem:[#allocation2 + $0x30] sm:$0xff] %v144_v21 }
  0xd4   :  { %v134_v22 = vpop.f32.mrf.mxu0  ;;  %v146_v23 = vpop.f32.mrf.mxu1 }
  0xd5   :  { %152 = vst [vmem:[#allocation2 + $0x18] sm:$0xff] %v134_v22  ;;  %156 = vst [vmem:[#allocation2 + $0x38] sm:$0xff] %v146_v23 }
  0xd6   :  { %205 = shalt.err (!%p202_p4)
}
  0xd7   :  { %s219_s20 = smov 256   ;;  %s220_s21 = smov 16  }
  0xd8   :  { %168 = dma.vmem_to_hbm [thread:$0]  %s163_s19, 1024, %s256_s2, [#allocation3], %s219_s20, %s219_s20, %s220_s21  }
  0xd9   :  { %214 = dma.done.wait [#allocation3], 1024  }
  0xda   :  { %215 = vsyncadd [#allocation3], 4294966272 }
  0xdb   :  { %172 = vsyncpa [#allocation3], 1 }

</bundles_post_ra>
